<compile_context>
chip_gen: v6e
topology: v6e:2x2x1
jax: 0.10.0
libtpu: 0.0.40
codegen_flags: <defaults>
</compile_context>

<pallas_src>
import functools

import jax
import jax.numpy as jnp
from jax.experimental import pallas as pl
from jax.experimental.pallas import tpu as pltpu

_LANE = 128


def _rawfeatnorm_kernel(x_ref, w_ref, b_ref, o_ref, *, eps: float, n_rows: int):
    x = x_ref[...].astype(jnp.float32)                 # (N, TF)
    mean = jnp.mean(x, axis=0, keepdims=True)          # (1, TF)
    diff = x - mean
    # torch.std default: unbiased (divide by N-1)
    var = jnp.sum(diff * diff, axis=0, keepdims=True) / jnp.float32(n_rows - 1)
    std = jnp.sqrt(var)
    # One reciprocal per feature column (EUP), then cheap VPU multiplies.
    inv = pl.reciprocal(std + jnp.float32(eps))        # (1, TF)
    y = diff * inv
    y = y * w_ref[...] + b_ref[...]
    o_ref[...] = y.astype(o_ref.dtype)


def _pick_tile_f(n_rows: int, f_pad128: int,
                 vmem_budget_bytes: int = 48 * 1024 * 1024) -> int:
    """Largest multiple-of-128 column-strip width that fits the VMEM budget.

    Budget per feature column ~ 5 f32 copies of the N rows:
    2x input double-buffer + 2x output double-buffer + ~1 f32 temp.
    """
    bytes_per_col = 5 * max(n_rows, 1) * 4
    max_cols = max(_LANE, vmem_budget_bytes // bytes_per_col)
    tf = (max_cols // _LANE) * _LANE
    tf = min(tf, 2048, f_pad128)
    return max(tf, _LANE)


def raw_feat_norm(x, weight=None, bias=None, eps: float = 1e-5, tile_f: int | None = None):
    """x: (N, F); weight/bias: (F,) (None -> affine identity, i.e. ones/zeros)."""
    n, f = x.shape
    if weight is None:
        weight = jnp.ones((f,), jnp.float32)
    if bias is None:
        bias = jnp.zeros((f,), jnp.float32)

    # Lane-dense tiling: pad feature dim up to a multiple of the strip width.
    f_pad128 = ((f + _LANE - 1) // _LANE) * _LANE
    tf = tile_f if tile_f is not None else _pick_tile_f(n, f_pad128)
    f_padded = ((f + tf - 1) // tf) * tf
    pad = f_padded - f

    xp = jnp.pad(x, ((0, 0), (0, pad))) if pad else x
    wp = weight.reshape(1, f).astype(jnp.float32)
    bp = bias.reshape(1, f).astype(jnp.float32)
    if pad:
        wp = jnp.pad(wp, ((0, 0), (0, pad)))
        bp = jnp.pad(bp, ((0, 0), (0, pad)))

    kernel = functools.partial(_rawfeatnorm_kernel, eps=eps, n_rows=n)
    grid = (f_padded // tf,)

    out = pl.pallas_call(
        kernel,
        out_shape=jax.ShapeDtypeStruct((n, f_padded), x.dtype),
        grid=grid,
        in_specs=[
            pl.BlockSpec((n, tf), lambda j: (0, j)),   # x column strip
            pl.BlockSpec((1, tf), lambda j: (0, j)),   # weight strip
            pl.BlockSpec((1, tf), lambda j: (0, j)),   # bias strip
        ],
        out_specs=pl.BlockSpec((n, tf), lambda j: (0, j)),
        compiler_params=pltpu.CompilerParams(
            dimension_semantics=("parallel",),          # 2x on v7x megacore
            vmem_limit_bytes=56 * 1024 * 1024,          # above 16/32 MiB defaults, < v7x 64 MiB
        ),
    )(xp, wp, bp)

    return out[:, :f] if pad else out


if __name__ == "__main__":
    num_features = 32
    batch = 16
    eps = 1e-5

    key = jax.random.PRNGKey(0)
    x = jax.random.normal(key, (batch, num_features), dtype=jnp.float32)

    # Deterministic parameter init matching reset_parameters(): ones / zeros.
    weight = jnp.ones((num_features,), dtype=jnp.float32)
    bias = jnp.zeros((num_features,), dtype=jnp.float32)

    out = raw_feat_norm(x, weight, bias, eps=eps)
    out = jax.block_until_ready(out)

    # Reference check (pure JAX, mirrors torch semantics with unbiased std).
    mean = x.mean(axis=0)
    std = jnp.sqrt(jnp.sum((x - mean) ** 2, axis=0) / (batch - 1))
    ref = (x - mean) / (std + eps) * weight + bias
    assert out.shape == x.shape, "shape mismatch"
    assert jnp.allclose(out, ref, atol=1e-5, rtol=1e-5), "mismatch vs reference"

    print("KERNEL_OK")
</pallas_src>

<mosaic_0001>
module attributes {stable_mosaic.version = 11 : i64} {
  func.func @_rawfeatnorm_kernel(%arg0: i32, %arg1: memref<16x128xf32, #tpu.memory_space<vmem>>, %arg2: memref<1x128xf32, #tpu.memory_space<vmem>>, %arg3: memref<1x128xf32, #tpu.memory_space<vmem>>, %arg4: memref<16x128xf32, #tpu.memory_space<vmem>>) attributes {dimension_semantics = [#tpu.dimension_semantics<parallel>], iteration_bounds = array<i64: 1>, scalar_prefetch = 0 : i64, scratch_operands = 0 : i64, tpu.core_type = #tpu.core_type<tc>, window_params = [{transform_indices = @transform_0, window_bounds = array<i64: 16, 128>}, {transform_indices = @transform_1, window_bounds = array<i64: 1, 128>}, {transform_indices = @transform_2, window_bounds = array<i64: 1, 128>}, {transform_indices = @transform_3, window_bounds = array<i64: 16, 128>}]} {
    %c0 = arith.constant 0 : index
    %c0_0 = arith.constant 0 : index
    %0 = vector.load %arg1[%c0, %c0_0] : memref<16x128xf32, #tpu.memory_space<vmem>>, vector<16x128xf32>
    %cst = arith.constant dense<0.000000e+00> : vector<128xf32>
    %1 = vector.multi_reduction <add>, %0, %cst [0] : vector<16x128xf32> to vector<128xf32>
    %2 = vector.shape_cast %1 : vector<128xf32> to vector<1x128xf32>
    %cst_1 = arith.constant 1.600000e+01 : f32
    %3 = vector.broadcast %cst_1 : f32 to vector<1x128xf32>
    %4 = arith.divf %2, %3 : vector<1x128xf32>
    %5 = vector.broadcast %4 : vector<1x128xf32> to vector<16x128xf32>
    %6 = arith.subf %0, %5 : vector<16x128xf32>
    %7 = arith.mulf %6, %6 : vector<16x128xf32>
    %cst_2 = arith.constant dense<0.000000e+00> : vector<128xf32>
    %8 = vector.multi_reduction <add>, %7, %cst_2 [0] : vector<16x128xf32> to vector<128xf32>
    %9 = vector.shape_cast %8 : vector<128xf32> to vector<1x128xf32>
    %cst_3 = arith.constant 1.500000e+01 : f32
    %10 = vector.broadcast %cst_3 : f32 to vector<1x128xf32>
    %11 = arith.divf %9, %10 : vector<1x128xf32>
    %12 = math.sqrt %11 : vector<1x128xf32>
    %cst_4 = arith.constant 9.99999974E-6 : f32
    %13 = vector.broadcast %cst_4 : f32 to vector<1x128xf32>
    %14 = arith.addf %12, %13 : vector<1x128xf32>
    %15 = tpu.reciprocal %14 : vector<1x128xf32> -> vector<1x128xf32>
    %16 = vector.broadcast %15 : vector<1x128xf32> to vector<16x128xf32>
    %17 = arith.mulf %6, %16 : vector<16x128xf32>
    %c0_5 = arith.constant 0 : index
    %c0_6 = arith.constant 0 : index
    %18 = vector.load %arg2[%c0_5, %c0_6] : memref<1x128xf32, #tpu.memory_space<vmem>>, vector<1x128xf32>
    %19 = vector.broadcast %18 : vector<1x128xf32> to vector<16x128xf32>
    %20 = arith.mulf %17, %19 : vector<16x128xf32>
    %c0_7 = arith.constant 0 : index
    %c0_8 = arith.constant 0 : index
    %21 = vector.load %arg3[%c0_7, %c0_8] : memref<1x128xf32, #tpu.memory_space<vmem>>, vector<1x128xf32>
    %22 = vector.broadcast %21 : vector<1x128xf32> to vector<16x128xf32>
    %23 = arith.addf %20, %22 : vector<16x128xf32>
    %c0_9 = arith.constant 0 : index
    %c0_10 = arith.constant 0 : index
    %24 = vector.load %arg4[%c0_9, %c0_10] : memref<16x128xf32, #tpu.memory_space<vmem>>, vector<16x128xf32>
    tpu.vector_store %arg4[%c0_9, %c0_10], %23 {strides = array<i32>} : memref<16x128xf32, #tpu.memory_space<vmem>>, vector<16x128xf32>,
    return
  }
  func.func @transform_0(%arg0: i32) -> (i32, i32) {
    %c0_i32 = arith.constant 0 : i32
    %c0_i32_0 = arith.constant 0 : i32
    return %c0_i32, %arg0 : i32, i32
  }
  func.func @transform_1(%arg0: i32) -> (i32, i32) {
    %c0_i32 = arith.constant 0 : i32
    %c0_i32_0 = arith.constant 0 : i32
    return %c0_i32, %arg0 : i32, i32
  }
  func.func @transform_2(%arg0: i32) -> (i32, i32) {
    %c0_i32 = arith.constant 0 : i32
    %c0_i32_0 = arith.constant 0 : i32
    return %c0_i32, %arg0 : i32, i32
  }
  func.func @transform_3(%arg0: i32) -> (i32, i32) {
    %c0_i32 = arith.constant 0 : i32
    %c0_i32_0 = arith.constant 0 : i32
    return %c0_i32, %arg0 : i32, i32
  }
}

</mosaic_0001>

<bundles_post_ra>
// kernel: tpu_custom_call.1
= control target key start
LH: loop header
LB: loop body
LE: loop exit
PB: predicated region body
PF: predicated region fallthrough
CT: control target
= control target key end

     0   :  { %8 = vsyncpa [#allocation3], 0  ;;  %s197_s0 = inlined_call_operand.hbm [shape: f32[16,128], index: 0, kind: input, shape index: {}]   ;;  %s198_s1 = inlined_call_operand.vmem [shape: f32[1,128], index: 1, kind: input, shape index: {}]   ;;  %s199_s2 = inlined_call_operand.vmem [shape: f32[1,128], index: 2, kind: input, shape index: {}]   ;;  %s200_s3 = inlined_call_operand.hbm [shape: f32[16,128], index: 3, kind: output, shape index: {}]  }
   0x1   :  { %9 = vsyncpa [#allocation4], 0  ;;  %s155_s12 = smov [#allocation2]  }
   0x2   :  { %s15_s13 = sshll.u32 %s155_s12, 4  ;;  %s16_s13 = int_to_ptr.vmem [resolvable:$true] %s15_s13 }
   0x3   :  { %s119_s14 = scalar_lea.vmem %s16_s13, 256  ;;  %p124_p1 = scmp.lt.s32.totalorder %s16_s13, %s16_s13 }
   0x4   :  { %p120_p0 = scmp.ne.s32.totalorder %s16_s13, %s119_s14  ;;  %p125_p2 = scmp.lt.s32.totalorder %s119_s14, %s119_s14 }
   0x6   :  { %p126_p3 = por %p125_p2, %p124_p1 }
   0x8   :  { %p127_p4 = pnand %p126_p3, %p120_p0 }
   0xa   :  { %130 = shalt.err (!%p127_p4)
}
   0xb   :  { %s156_s15 = smov 128   ;;  %s157_s16 = smov 8  }
   0xc   :  { %21 = dma.hbm_to_vmem [thread:$0]  %s197_s0, 256, %s16_s13, [#allocation3], %s156_s15, %s156_s15, %s157_s16  }
   0xd   :  { %151 = dma.done.wait [#allocation3], 256  }
   0xe   :  { %152 = vsyncadd [#allocation3], 4294967040  ;;  %v29_v0 = vld [vmem:[#allocation2] sm:$0xff]  ;;  %v30_v1 = vld [vmem:[#allocation2 + $0x8] sm:$0xff]  ;;  %s158_s22 = smov [#allocation5]  }
   0xf   :  { %v31_v2 = vadd.f32 %v30_v1, %v29_v0  ;;  %v101_v29 = vld [vmem:[%s198_s1] ss:$0 sm:$0xff]  ;;  %s89_s23 = sshll.u32 %s158_s22, 4  ;;  %s90_s23 = int_to_ptr.vmem [resolvable:$true] %s89_s23 }
  0x10   :  { %v102_v32 = vld [vmem:[%s199_s2] ss:$0 sm:$0xff]  ;;  %s131_s24 = scalar_lea.vmem %s90_s23, 256  ;;  %p136_p6 = scmp.lt.s32.totalorder %s90_s23, %s90_s23 }
  0x11   :  { %v32_v3 = vrot.slane %v31_v2, 4  ;;  %p132_p5 = scmp.ne.s32.totalorder %s90_s23, %s131_s24  ;;  %p137_p7 = scmp.lt.s32.totalorder %s131_s24, %s131_s24 }
  0x13   :  { %v33_v4 = vadd.f32 %v32_v3, %v31_v2  ;;  %p138_p8 = por %p137_p7, %p136_p6 }
  0x15   :  { %v34_v5 = vrot.slane %v33_v4, 2  ;;  %p139_p9 = pnand %p138_p8, %p132_p5 }
  0x17   :  { %v35_v6 = vadd.f32 %v34_v5, %v33_v4 }
  0x19   :  { %v36_v7 = vrot.slane %v35_v6, 1 }
  0x1b   :  { %v37_v8 = vadd.f32 %v36_v7, %v35_v6 }
  0x1d   :  { %v39_v9 = vmul.f32 0.0625, %v37_v8 }
  0x1f   :  { %v40_v10 = vsub.f32 %v29_v0, %v39_v9  ;;  %v41_v11 = vsub.f32 %v30_v1, %v39_v9 }
  0x21   :  { %v42_v12 = vmul.f32 %v40_v10, %v40_v10  ;;  %v43_v13 = vmul.f32 %v41_v11, %v41_v11 }
  0x23   :  { %v44_v14 = vadd.f32 %v43_v13, %v42_v12 }
  0x25   :  { %v45_v15 = vrot.slane %v44_v14, 4 }
  0x27   :  { %v46_v16 = vadd.f32 %v45_v15, %v44_v14 }
  0x29   :  { %v47_v17 = vrot.slane %v46_v16, 2 }
  0x2b   :  { %v48_v18 = vadd.f32 %v47_v17, %v46_v16 }
  0x2d   :  { %v49_v19 = vrot.slane %v48_v18, 1 }
  0x2f   :  { %v50_v20 = vadd.f32 %v49_v19, %v48_v18 }
  0x31   :  { %v52_v21 = vmul.f32 0.06666667, %v50_v20 }
  0x33   :  { %107 = vrsqrt.f32 %v52_v21  ;;  %vm55_vm0 = vcmp.eq.f32.partialorder %v52_v21, inf  ;;  %v58_v23 = vand.u32 2147483648, %v52_v21  ;;  %vm57_vm1 = vcmp.eq.f32.partialorder %v52_v21, 0.0 }
  0x40   :  { %v108_v22 = vpop.eup %107 }
  0x41   :  { %v54_v24 = vmul.f32 %v108_v22, %v52_v21 }
  0x43   :  { %v56_v25 = vsel %vm55_vm0, %v52_v21, %v54_v24 }
  0x44   :  { %v59_v26 = vsel %vm57_vm1, %v58_v23, %v56_v25 }
  0x45   :  { %v60_v27 = vadd.f32 1e-05, %v59_v26 }
  0x47   :  { %109 = vrcp.f32 %v60_v27 }
  0x54   :  { %v110_v28 = vpop.eup %109 }
  0x55   :  { %v62_v30 = vmul.f32 %v110_v28, %v40_v10  ;;  %v63_v31 = vmul.f32 %v110_v28, %v41_v11 }
  0x57   :  { %v71_v33 = vmul.f32 %v101_v29, %v62_v30  ;;  %v72_v34 = vmul.f32 %v101_v29, %v63_v31 }
  0x59   :  { %v80_v35 = vadd.f32 %v102_v32, %v71_v33  ;;  %v81_v36 = vadd.f32 %v102_v32, %v72_v34 }
  0x5b   :  { %82 = vst [vmem:[#allocation5] sm:$0xff] %v80_v35  ;;  %83 = vst [vmem:[#allocation5 + $0x8] sm:$0xff] %v81_v36 }
  0x5c   :  { %142 = shalt.err (!%p139_p9)
}
  0x5d   :  { %95 = dma.vmem_to_hbm [thread:$0]  %s90_s23, 256, %s200_s3, [#allocation4], %s156_s15, %s156_s15, %s157_s16  }
  0x5e   :  { %153 = dma.done.wait [#allocation4], 256  }
  0x5f   :  { %154 = vsyncadd [#allocation4], 4294967040 }
  0x60   :  { %99 = vsyncpa [#allocation3], 1 }
  0x61   :  { %100 = vsyncpa [#allocation4], 1 }

</bundles_post_ra>
